<compile_context>
chip_gen: v6e
topology: v6e:2x2x1
jax: 0.10.0
libtpu: 0.0.40
codegen_flags: <defaults>
</compile_context>

<pallas_src>
import jax
import jax.numpy as jnp
from jax.experimental import pallas as pl
from jax.experimental.pallas import tpu as pltpu


# ----------------------------------------------------------------------------
# Pallas kernel: fused forward of NaiveMLP (after embedding lookup)
# ----------------------------------------------------------------------------
def naive_mlp_kernel(
    x_ref, demb_ref,
    p1w_ref, p1b_ref, p2w_ref, p2b_ref,
    te0w_ref, te0b_ref, te1w_ref, te1b_ref, tefw_ref,
    xe0w_ref, xe0b_ref, xe1w_ref, xe1b_ref, xefw_ref,
    n0wx_ref, n0wt_ref, n0b_ref, n1w_ref, n1b_ref, nfwneg_ref,
    out_ref,
):
    def dot16(h, w_ref):
        # bf16 operands, f32 accumulation on the MXU.
        return jnp.dot(h.astype(w_ref.dtype), w_ref[...],
                       preferred_element_type=jnp.float32)

    def lin(h, w_ref, b_ref=None):
        y = dot16(h, w_ref)
        if b_ref is not None:
            y = y + b_ref[...]            # bias is (1, out) f32 -> broadcasts
        return y

    def silu(v):
        # sigmoid denominator reciprocal on the EUP slot (free alongside VPU)
        return v * pl.reciprocal(1.0 + jnp.exp(-v), approx=True)

    def lrelu(v):  # F.leaky_relu(v, 0.4)
        return jnp.where(v >= 0.0, v, 0.4 * v)

    # DiffusionEmbedding projections
    t = silu(lin(demb_ref[...], p1w_ref, p1b_ref))
    t = silu(lin(t, p2w_ref, p2b_ref))

    # t_encoder MLP (leaky_relu(0.4) on hidden layers, final layer bias-free)
    t = lrelu(lin(t, te0w_ref, te0b_ref))
    t = lrelu(lin(t, te1w_ref, te1b_ref))
    temb = lin(t, tefw_ref)

    # x_encoder MLP
    h = lrelu(lin(x_ref[...], xe0w_ref, xe0b_ref))
    h = lrelu(lin(h, xe1w_ref, xe1b_ref))
    xemb = lin(h, xefw_ref)

    # concat-free decoder entry: two MXU dots accumulate into one f32 result
    n = lrelu(dot16(xemb, n0wx_ref) + dot16(temb, n0wt_ref) + n0b_ref[...])
    n = lrelu(lin(n, n1w_ref, n1b_ref))

    # final-layer weight is pre-negated -> no elementwise negation pass
    out_ref[...] = lin(n, nfwneg_ref)


# ----------------------------------------------------------------------------
# Parameter construction (deterministic, matches the module's shapes)
# ----------------------------------------------------------------------------
def build_embedding_table(temb_dim: int, max_steps: int) -> jnp.ndarray:
    steps = jnp.arange(max_steps, dtype=jnp.float32)[:, None]          # (S, 1)
    dims = jnp.arange(temb_dim, dtype=jnp.float32)[None, :]            # (1, D)
    table = steps * 10.0 ** (dims * 4.0 / 63.0)                        # (S, D)
    return jnp.concatenate([jnp.sin(table), jnp.cos(table)], axis=1)   # (S, 2D)


def init_params(key, temb_dim, output_shape, enc_shapes, dec_shapes):
    t_enc_dim = 2 * temb_dim

    def linear(key, fan_in, fan_out, bias=True):
        kw, kb = jax.random.split(key)
        w = jax.random.normal(kw, (fan_in, fan_out), jnp.float32) * (1.0 / jnp.sqrt(fan_in))
        b = (jax.random.normal(kb, (1, fan_out), jnp.float32) * 0.01) if bias else None
        return w, b

    keys = jax.random.split(key, 16)
    p = {}
    p["p1w"], p["p1b"] = linear(keys[0], 2 * temb_dim, temb_dim)
    p["p2w"], p["p2b"] = linear(keys[1], temb_dim, temb_dim)
    p["te0w"], p["te0b"] = linear(keys[2], temb_dim, enc_shapes[0])
    p["te1w"], p["te1b"] = linear(keys[3], enc_shapes[0], enc_shapes[1])
    p["tefw"], _ = linear(keys[4], enc_shapes[1], t_enc_dim, bias=False)
    p["xe0w"], p["xe0b"] = linear(keys[5], output_shape, enc_shapes[0])
    p["xe1w"], p["xe1b"] = linear(keys[6], enc_shapes[0], enc_shapes[1])
    p["xefw"], _ = linear(keys[7], enc_shapes[1], t_enc_dim, bias=False)
    p["n0w"], p["n0b"] = linear(keys[8], 2 * t_enc_dim, dec_shapes[0])
    p["n1w"], p["n1b"] = linear(keys[9], dec_shapes[0], dec_shapes[1])
    p["nfw"], _ = linear(keys[10], dec_shapes[1], output_shape, bias=False)
    return p


# ----------------------------------------------------------------------------
# Plain-JAX glue: diffusion embedding lookup / lerp (data-dependent gather)
# ----------------------------------------------------------------------------
def diffusion_embedding_lookup(times, table):
    if jnp.issubdtype(times.dtype, jnp.integer):
        return table[times]
    max_idx = table.shape[0] - 1
    low_idx = jnp.clip(jnp.floor(times), 0, max_idx).astype(jnp.int32)
    high_idx = jnp.clip(jnp.ceil(times), 0, max_idx).astype(jnp.int32)
    low = table[low_idx]
    high = table[high_idx]
    return low + (times - low_idx.astype(times.dtype))[:, None] * (high - low)


def _round_up(x, m):
    return (x + m - 1) // m * m


# ----------------------------------------------------------------------------
# Wrapper: one fused pallas_call with a batch grid and VMEM-resident weights
# ----------------------------------------------------------------------------
def naive_mlp_forward(inputs, times, params, embedding_table, *, max_batch_tile=1024):
    # inputs: (B, output_shape) f32; times: (B,) f32 or int32
    B, out_dim = inputs.shape
    temb2 = embedding_table.shape[1]

    demb = diffusion_embedding_lookup(times, embedding_table)

    # Batch tile: multiple of 8 (f32 sublanes), capped so double-buffered tiles
    # plus the (tiny) bf16 weight set stay far below every chip's VMEM budget.
    TB = min(max_batch_tile, _round_up(B, 8))
    Bp = _round_up(B, TB)
    if Bp != B:
        inputs_p = jnp.zeros((Bp, out_dim), inputs.dtype).at[:B].set(inputs)
        demb_p = jnp.zeros((Bp, temb2), demb.dtype).at[:B].set(demb)
    else:
        inputs_p, demb_p = inputs, demb

    bf16 = lambda a: a.astype(jnp.bfloat16)
    f32 = lambda a: a.astype(jnp.float32)

    # Split decoder first-layer weight (concat-free) and fold negation into nfw.
    t_enc_dim = params["tefw"].shape[1]
    n0w_x = params["n0w"][:t_enc_dim]
    n0w_t = params["n0w"][t_enc_dim:]
    nfw_neg = -params["nfw"]

    w_args = [
        bf16(params["p1w"]), f32(params["p1b"]),
        bf16(params["p2w"]), f32(params["p2b"]),
        bf16(params["te0w"]), f32(params["te0b"]),
        bf16(params["te1w"]), f32(params["te1b"]),
        bf16(params["tefw"]),
        bf16(params["xe0w"]), f32(params["xe0b"]),
        bf16(params["xe1w"]), f32(params["xe1b"]),
        bf16(params["xefw"]),
        bf16(n0w_x), bf16(n0w_t), f32(params["n0b"]),
        bf16(params["n1w"]), f32(params["n1b"]),
        bf16(nfw_neg),
    ]

    grid = (Bp // TB,)

    def row_spec(cols):
        return pl.BlockSpec((TB, cols), lambda i: (i, 0))

    # Weights: full-array blocks with a constant index_map -> fetched once,
    # VMEM-resident across all batch-grid steps.
    w_specs = [pl.BlockSpec(w.shape, lambda i: (0, 0)) for w in w_args]

    in_specs = [row_spec(out_dim), row_spec(temb2)] + w_specs
    out_spec = row_spec(out_dim)

    # Advisory scheduling hint for XLA.
    matmul_weights = [w for w in w_args if w.dtype == jnp.bfloat16]
    flops_per_row = 2 * sum(int(w.shape[0]) * int(w.shape[1]) for w in matmul_weights)
    weight_bytes = sum(int(w.size) * w.dtype.itemsize for w in w_args)
    cost = pl.CostEstimate(
        flops=int(Bp) * flops_per_row,
        transcendentals=int(Bp) * 4 * int(params["p1w"].shape[1]),
        bytes_accessed=int(Bp) * (out_dim + temb2 + out_dim) * 4 + weight_bytes,
    )

    out = pl.pallas_call(
        naive_mlp_kernel,
        out_shape=jax.ShapeDtypeStruct((Bp, out_dim), jnp.float32),
        grid=grid,
        in_specs=in_specs,
        out_specs=out_spec,
        compiler_params=pltpu.CompilerParams(
            dimension_semantics=("parallel",),   # 2 TCs on v7x; no-op on v5e/v6e
        ),
        cost_estimate=cost,
    )(inputs_p, demb_p, *w_args)

    return out[:B]
    # Note: output last-dim is only `output_shape` lanes (masked stores); a
    # lane-dense transposed writeback was evaluated but skipped — output traffic
    # is a small fraction of the total here and the wrapper-side re-transpose
    # would offset the gain.


# ----------------------------------------------------------------------------
# Pure-JAX references (exact f32, and bf16-operand-matched)
# ----------------------------------------------------------------------------
def reference_forward(inputs, times, p, emb, cast_to_bf16=False):
    def maybe16(a):
        return a.astype(jnp.bfloat16) if cast_to_bf16 else a

    def lin(h, w, b=None):
        y = jnp.dot(maybe16(h), maybe16(w), preferred_element_type=jnp.float32)
        return y if b is None else y + b

    def silu(v):
        return v * jax.nn.sigmoid(v)

    def lrelu(v):
        return jnp.where(v >= 0.0, v, 0.4 * v)

    demb = diffusion_embedding_lookup(times, emb)

    t = silu(lin(demb, p["p1w"], p["p1b"]))
    t = silu(lin(t, p["p2w"], p["p2b"]))
    t = lrelu(lin(t, p["te0w"], p["te0b"]))
    t = lrelu(lin(t, p["te1w"], p["te1b"]))
    temb = lin(t, p["tefw"])

    h = lrelu(lin(inputs, p["xe0w"], p["xe0b"]))
    h = lrelu(lin(h, p["xe1w"], p["xe1b"]))
    xemb = lin(h, p["xefw"])

    hc = jnp.concatenate([xemb, temb], axis=-1)
    n = lrelu(lin(hc, p["n0w"], p["n0b"]))
    n = lrelu(lin(n, p["n1w"], p["n1b"]))
    return -lin(n, p["nfw"])


if __name__ == "__main__":
    # Small, module-consistent shapes
    temb_dim = 32
    max_diff_steps = 100
    output_shape = 8           # dimensionality of the data / score output
    enc_shapes = [32, 32]
    dec_shapes = [64, 64]
    batch = 8

    key = jax.random.PRNGKey(0)
    k_in, k_t, k_param = jax.random.split(key, 3)

    inputs = jax.random.normal(k_in, (batch, output_shape), jnp.float32)
    times = jax.random.uniform(
        k_t, (batch,), jnp.float32, minval=0.0, maxval=float(max_diff_steps - 1)
    )

    params = init_params(k_param, temb_dim, output_shape, enc_shapes, dec_shapes)
    emb_table = build_embedding_table(temb_dim, max_diff_steps)

    out = naive_mlp_forward(inputs, times, params, emb_table)
    out = jax.block_until_ready(out)

    ref_matched = reference_forward(inputs, times, params, emb_table, cast_to_bf16=True)
    ref_f32 = reference_forward(inputs, times, params, emb_table, cast_to_bf16=False)

    assert out.shape == (batch, output_shape)
    assert jnp.allclose(out, ref_matched, rtol=3e-2, atol=3e-2), \
        "Pallas output mismatch vs bf16-matched JAX reference"
    assert jnp.allclose(out, ref_f32, rtol=1e-1, atol=1e-1), \
        "Pallas output mismatch vs f32 JAX reference"

    print("KERNEL_OK")
</pallas_src>

<mosaic_0001>
module attributes {stable_mosaic.version = 11 : i64} {
  func.func @naive_mlp_kernel(%arg0: i32, %arg1: memref<8x8xf32, #tpu.memory_space<vmem>>, %arg2: memref<8x64xf32, #tpu.memory_space<vmem>>, %arg3: memref<64x32xbf16, #tpu.memory_space<vmem>>, %arg4: memref<1x32xf32, #tpu.memory_space<vmem>>, %arg5: memref<32x32xbf16, #tpu.memory_space<vmem>>, %arg6: memref<1x32xf32, #tpu.memory_space<vmem>>, %arg7: memref<32x32xbf16, #tpu.memory_space<vmem>>, %arg8: memref<1x32xf32, #tpu.memory_space<vmem>>, %arg9: memref<32x32xbf16, #tpu.memory_space<vmem>>, %arg10: memref<1x32xf32, #tpu.memory_space<vmem>>, %arg11: memref<32x64xbf16, #tpu.memory_space<vmem>>, %arg12: memref<8x32xbf16, #tpu.memory_space<vmem>>, %arg13: memref<1x32xf32, #tpu.memory_space<vmem>>, %arg14: memref<32x32xbf16, #tpu.memory_space<vmem>>, %arg15: memref<1x32xf32, #tpu.memory_space<vmem>>, %arg16: memref<32x64xbf16, #tpu.memory_space<vmem>>, %arg17: memref<64x64xbf16, #tpu.memory_space<vmem>>, %arg18: memref<64x64xbf16, #tpu.memory_space<vmem>>, %arg19: memref<1x64xf32, #tpu.memory_space<vmem>>, %arg20: memref<64x64xbf16, #tpu.memory_space<vmem>>, %arg21: memref<1x64xf32, #tpu.memory_space<vmem>>, %arg22: memref<64x8xbf16, #tpu.memory_space<vmem>>, %arg23: memref<8x8xf32, #tpu.memory_space<vmem>>) attributes {dimension_semantics = [#tpu.dimension_semantics<parallel>], iteration_bounds = array<i64: 1>, scalar_prefetch = 0 : i64, scratch_operands = 0 : i64, tpu.core_type = #tpu.core_type<tc>, window_params = [{transform_indices = @transform_0, window_bounds = array<i64: 8, 8>}, {transform_indices = @transform_1, window_bounds = array<i64: 8, 64>}, {pipeline_mode = #tpu.pipeline_mode<synchronous>, transform_indices = @transform_2, window_bounds = array<i64: 64, 32>}, {pipeline_mode = #tpu.pipeline_mode<synchronous>, transform_indices = @transform_3, window_bounds = array<i64: 1, 32>}, {pipeline_mode = #tpu.pipeline_mode<synchronous>, transform_indices = @transform_4, window_bounds = array<i64: 32, 32>}, {pipeline_mode = #tpu.pipeline_mode<synchronous>, transform_indices = @transform_5, window_bounds = array<i64: 1, 32>}, {pipeline_mode = #tpu.pipeline_mode<synchronous>, transform_indices = @transform_6, window_bounds = array<i64: 32, 32>}, {pipeline_mode = #tpu.pipeline_mode<synchronous>, transform_indices = @transform_7, window_bounds = array<i64: 1, 32>}, {pipeline_mode = #tpu.pipeline_mode<synchronous>, transform_indices = @transform_8, window_bounds = array<i64: 32, 32>}, {pipeline_mode = #tpu.pipeline_mode<synchronous>, transform_indices = @transform_9, window_bounds = array<i64: 1, 32>}, {pipeline_mode = #tpu.pipeline_mode<synchronous>, transform_indices = @transform_10, window_bounds = array<i64: 32, 64>}, {pipeline_mode = #tpu.pipeline_mode<synchronous>, transform_indices = @transform_11, window_bounds = array<i64: 8, 32>}, {pipeline_mode = #tpu.pipeline_mode<synchronous>, transform_indices = @transform_12, window_bounds = array<i64: 1, 32>}, {pipeline_mode = #tpu.pipeline_mode<synchronous>, transform_indices = @transform_13, window_bounds = array<i64: 32, 32>}, {pipeline_mode = #tpu.pipeline_mode<synchronous>, transform_indices = @transform_14, window_bounds = array<i64: 1, 32>}, {pipeline_mode = #tpu.pipeline_mode<synchronous>, transform_indices = @transform_15, window_bounds = array<i64: 32, 64>}, {pipeline_mode = #tpu.pipeline_mode<synchronous>, transform_indices = @transform_16, window_bounds = array<i64: 64, 64>}, {pipeline_mode = #tpu.pipeline_mode<synchronous>, transform_indices = @transform_17, window_bounds = array<i64: 64, 64>}, {pipeline_mode = #tpu.pipeline_mode<synchronous>, transform_indices = @transform_18, window_bounds = array<i64: 1, 64>}, {pipeline_mode = #tpu.pipeline_mode<synchronous>, transform_indices = @transform_19, window_bounds = array<i64: 64, 64>}, {pipeline_mode = #tpu.pipeline_mode<synchronous>, transform_indices = @transform_20, window_bounds = array<i64: 1, 64>}, {pipeline_mode = #tpu.pipeline_mode<synchronous>, transform_indices = @transform_21, window_bounds = array<i64: 64, 8>}, {transform_indices = @transform_22, window_bounds = array<i64: 8, 8>}]} {
    %c0 = arith.constant 0 : index
    %c0_0 = arith.constant 0 : index
    %0 = vector.load %arg2[%c0, %c0_0] : memref<8x64xf32, #tpu.memory_space<vmem>>, vector<8x64xf32>
    %1 = arith.truncf %0 : vector<8x64xf32> to vector<8x64xbf16>
    %c0_1 = arith.constant 0 : index
    %c0_2 = arith.constant 0 : index
    %2 = vector.load %arg3[%c0_1, %c0_2] : memref<64x32xbf16, #tpu.memory_space<vmem>>, vector<64x32xbf16>
    %cst = arith.constant dense<0.000000e+00> : vector<8x32xf32>
    %3 = tpu.matmul %1, %2, %cst {dimension_numbers = #tpu.dot_dimension_numbers<[1], [0], [0], [1], [0, 0, 1, 1], [], []>} : vector<8x64xbf16>, vector<64x32xbf16>, vector<8x32xf32> -> vector<8x32xf32>
    %c0_3 = arith.constant 0 : index
    %c0_4 = arith.constant 0 : index
    %4 = vector.load %arg4[%c0_3, %c0_4] : memref<1x32xf32, #tpu.memory_space<vmem>>, vector<1x32xf32>
    %5 = vector.broadcast %4 : vector<1x32xf32> to vector<8x32xf32>
    %6 = arith.addf %3, %5 : vector<8x32xf32>
    %cst_5 = arith.constant 0.000000e+00 : f32
    %7 = vector.broadcast %cst_5 : f32 to vector<8x32xf32>
    %8 = arith.subf %7, %6 : vector<8x32xf32>
    %9 = math.exp %8 : vector<8x32xf32>
    %cst_6 = arith.constant 1.000000e+00 : f32
    %10 = vector.broadcast %cst_6 : f32 to vector<8x32xf32>
    %11 = arith.addf %10, %9 : vector<8x32xf32>
    %12 = tpu.reciprocal %11 {approx = true} : vector<8x32xf32> -> vector<8x32xf32>
    %13 = arith.mulf %6, %12 : vector<8x32xf32>
    %14 = arith.truncf %13 : vector<8x32xf32> to vector<8x32xbf16>
    %c0_7 = arith.constant 0 : index
    %c0_8 = arith.constant 0 : index
    %15 = vector.load %arg5[%c0_7, %c0_8] : memref<32x32xbf16, #tpu.memory_space<vmem>>, vector<32x32xbf16>
    %cst_9 = arith.constant dense<0.000000e+00> : vector<8x32xf32>
    %16 = tpu.matmul %14, %15, %cst_9 {dimension_numbers = #tpu.dot_dimension_numbers<[1], [0], [0], [1], [0, 0, 1, 1], [], []>} : vector<8x32xbf16>, vector<32x32xbf16>, vector<8x32xf32> -> vector<8x32xf32>
    %c0_10 = arith.constant 0 : index
    %c0_11 = arith.constant 0 : index
    %17 = vector.load %arg6[%c0_10, %c0_11] : memref<1x32xf32, #tpu.memory_space<vmem>>, vector<1x32xf32>
    %18 = vector.broadcast %17 : vector<1x32xf32> to vector<8x32xf32>
    %19 = arith.addf %16, %18 : vector<8x32xf32>
    %cst_12 = arith.constant 0.000000e+00 : f32
    %20 = vector.broadcast %cst_12 : f32 to vector<8x32xf32>
    %21 = arith.subf %20, %19 : vector<8x32xf32>
    %22 = math.exp %21 : vector<8x32xf32>
    %cst_13 = arith.constant 1.000000e+00 : f32
    %23 = vector.broadcast %cst_13 : f32 to vector<8x32xf32>
    %24 = arith.addf %23, %22 : vector<8x32xf32>
    %25 = tpu.reciprocal %24 {approx = true} : vector<8x32xf32> -> vector<8x32xf32>
    %26 = arith.mulf %19, %25 : vector<8x32xf32>
    %27 = arith.truncf %26 : vector<8x32xf32> to vector<8x32xbf16>
    %c0_14 = arith.constant 0 : index
    %c0_15 = arith.constant 0 : index
    %28 = vector.load %arg7[%c0_14, %c0_15] : memref<32x32xbf16, #tpu.memory_space<vmem>>, vector<32x32xbf16>
    %cst_16 = arith.constant dense<0.000000e+00> : vector<8x32xf32>
    %29 = tpu.matmul %27, %28, %cst_16 {dimension_numbers = #tpu.dot_dimension_numbers<[1], [0], [0], [1], [0, 0, 1, 1], [], []>} : vector<8x32xbf16>, vector<32x32xbf16>, vector<8x32xf32> -> vector<8x32xf32>
    %c0_17 = arith.constant 0 : index
    %c0_18 = arith.constant 0 : index
    %30 = vector.load %arg8[%c0_17, %c0_18] : memref<1x32xf32, #tpu.memory_space<vmem>>, vector<1x32xf32>
    %31 = vector.broadcast %30 : vector<1x32xf32> to vector<8x32xf32>
    %32 = arith.addf %29, %31 : vector<8x32xf32>
    %cst_19 = arith.constant 0.000000e+00 : f32
    %33 = vector.broadcast %cst_19 : f32 to vector<8x32xf32>
    %34 = arith.cmpf oge, %32, %33 : vector<8x32xf32>
    %cst_20 = arith.constant 4.000000e-01 : f32
    %35 = vector.broadcast %cst_20 : f32 to vector<8x32xf32>
    %36 = arith.mulf %35, %32 : vector<8x32xf32>
    %37 = arith.select %34, %32, %36 : vector<8x32xi1>, vector<8x32xf32>
    %38 = arith.truncf %37 : vector<8x32xf32> to vector<8x32xbf16>
    %c0_21 = arith.constant 0 : index
    %c0_22 = arith.constant 0 : index
    %39 = vector.load %arg9[%c0_21, %c0_22] : memref<32x32xbf16, #tpu.memory_space<vmem>>, vector<32x32xbf16>
    %cst_23 = arith.constant dense<0.000000e+00> : vector<8x32xf32>
    %40 = tpu.matmul %38, %39, %cst_23 {dimension_numbers = #tpu.dot_dimension_numbers<[1], [0], [0], [1], [0, 0, 1, 1], [], []>} : vector<8x32xbf16>, vector<32x32xbf16>, vector<8x32xf32> -> vector<8x32xf32>
    %c0_24 = arith.constant 0 : index
    %c0_25 = arith.constant 0 : index
    %41 = vector.load %arg10[%c0_24, %c0_25] : memref<1x32xf32, #tpu.memory_space<vmem>>, vector<1x32xf32>
    %42 = vector.broadcast %41 : vector<1x32xf32> to vector<8x32xf32>
    %43 = arith.addf %40, %42 : vector<8x32xf32>
    %cst_26 = arith.constant 0.000000e+00 : f32
    %44 = vector.broadcast %cst_26 : f32 to vector<8x32xf32>
    %45 = arith.cmpf oge, %43, %44 : vector<8x32xf32>
    %cst_27 = arith.constant 4.000000e-01 : f32
    %46 = vector.broadcast %cst_27 : f32 to vector<8x32xf32>
    %47 = arith.mulf %46, %43 : vector<8x32xf32>
    %48 = arith.select %45, %43, %47 : vector<8x32xi1>, vector<8x32xf32>
    %49 = arith.truncf %48 : vector<8x32xf32> to vector<8x32xbf16>
    %c0_28 = arith.constant 0 : index
    %c0_29 = arith.constant 0 : index
    %50 = vector.load %arg11[%c0_28, %c0_29] : memref<32x64xbf16, #tpu.memory_space<vmem>>, vector<32x64xbf16>
    %cst_30 = arith.constant dense<0.000000e+00> : vector<8x64xf32>
    %51 = tpu.matmul %49, %50, %cst_30 {dimension_numbers = #tpu.dot_dimension_numbers<[1], [0], [0], [1], [0, 0, 1, 1], [], []>} : vector<8x32xbf16>, vector<32x64xbf16>, vector<8x64xf32> -> vector<8x64xf32>
    %c0_31 = arith.constant 0 : index
    %c0_32 = arith.constant 0 : index
    %52 = vector.load %arg1[%c0_31, %c0_32] : memref<8x8xf32, #tpu.memory_space<vmem>>, vector<8x8xf32>
    %53 = arith.truncf %52 : vector<8x8xf32> to vector<8x8xbf16>
    %c0_33 = arith.constant 0 : index
    %c0_34 = arith.constant 0 : index
    %54 = vector.load %arg12[%c0_33, %c0_34] : memref<8x32xbf16, #tpu.memory_space<vmem>>, vector<8x32xbf16>
    %cst_35 = arith.constant dense<0.000000e+00> : vector<8x32xf32>
    %55 = tpu.matmul %53, %54, %cst_35 {dimension_numbers = #tpu.dot_dimension_numbers<[1], [0], [0], [1], [0, 0, 1, 1], [], []>} : vector<8x8xbf16>, vector<8x32xbf16>, vector<8x32xf32> -> vector<8x32xf32>
    %c0_36 = arith.constant 0 : index
    %c0_37 = arith.constant 0 : index
    %56 = vector.load %arg13[%c0_36, %c0_37] : memref<1x32xf32, #tpu.memory_space<vmem>>, vector<1x32xf32>
    %57 = vector.broadcast %56 : vector<1x32xf32> to vector<8x32xf32>
    %58 = arith.addf %55, %57 : vector<8x32xf32>
    %cst_38 = arith.constant 0.000000e+00 : f32
    %59 = vector.broadcast %cst_38 : f32 to vector<8x32xf32>
    %60 = arith.cmpf oge, %58, %59 : vector<8x32xf32>
    %cst_39 = arith.constant 4.000000e-01 : f32
    %61 = vector.broadcast %cst_39 : f32 to vector<8x32xf32>
    %62 = arith.mulf %61, %58 : vector<8x32xf32>
    %63 = arith.select %60, %58, %62 : vector<8x32xi1>, vector<8x32xf32>
    %64 = arith.truncf %63 : vector<8x32xf32> to vector<8x32xbf16>
    %c0_40 = arith.constant 0 : index
    %c0_41 = arith.constant 0 : index
    %65 = vector.load %arg14[%c0_40, %c0_41] : memref<32x32xbf16, #tpu.memory_space<vmem>>, vector<32x32xbf16>
    %cst_42 = arith.constant dense<0.000000e+00> : vector<8x32xf32>
    %66 = tpu.matmul %64, %65, %cst_42 {dimension_numbers = #tpu.dot_dimension_numbers<[1], [0], [0], [1], [0, 0, 1, 1], [], []>} : vector<8x32xbf16>, vector<32x32xbf16>, vector<8x32xf32> -> vector<8x32xf32>
    %c0_43 = arith.constant 0 : index
    %c0_44 = arith.constant 0 : index
    %67 = vector.load %arg15[%c0_43, %c0_44] : memref<1x32xf32, #tpu.memory_space<vmem>>, vector<1x32xf32>
    %68 = vector.broadcast %67 : vector<1x32xf32> to vector<8x32xf32>
    %69 = arith.addf %66, %68 : vector<8x32xf32>
    %cst_45 = arith.constant 0.000000e+00 : f32
    %70 = vector.broadcast %cst_45 : f32 to vector<8x32xf32>
    %71 = arith.cmpf oge, %69, %70 : vector<8x32xf32>
    %cst_46 = arith.constant 4.000000e-01 : f32
    %72 = vector.broadcast %cst_46 : f32 to vector<8x32xf32>
    %73 = arith.mulf %72, %69 : vector<8x32xf32>
    %74 = arith.select %71, %69, %73 : vector<8x32xi1>, vector<8x32xf32>
    %75 = arith.truncf %74 : vector<8x32xf32> to vector<8x32xbf16>
    %c0_47 = arith.constant 0 : index
    %c0_48 = arith.constant 0 : index
    %76 = vector.load %arg16[%c0_47, %c0_48] : memref<32x64xbf16, #tpu.memory_space<vmem>>, vector<32x64xbf16>
    %cst_49 = arith.constant dense<0.000000e+00> : vector<8x64xf32>
    %77 = tpu.matmul %75, %76, %cst_49 {dimension_numbers = #tpu.dot_dimension_numbers<[1], [0], [0], [1], [0, 0, 1, 1], [], []>} : vector<8x32xbf16>, vector<32x64xbf16>, vector<8x64xf32> -> vector<8x64xf32>
    %78 = arith.truncf %77 : vector<8x64xf32> to vector<8x64xbf16>
    %c0_50 = arith.constant 0 : index
    %c0_51 = arith.constant 0 : index
    %79 = vector.load %arg17[%c0_50, %c0_51] : memref<64x64xbf16, #tpu.memory_space<vmem>>, vector<64x64xbf16>
    %cst_52 = arith.constant dense<0.000000e+00> : vector<8x64xf32>
    %80 = tpu.matmul %78, %79, %cst_52 {dimension_numbers = #tpu.dot_dimension_numbers<[1], [0], [0], [1], [0, 0, 1, 1], [], []>} : vector<8x64xbf16>, vector<64x64xbf16>, vector<8x64xf32> -> vector<8x64xf32>
    %81 = arith.truncf %51 : vector<8x64xf32> to vector<8x64xbf16>
    %c0_53 = arith.constant 0 : index
    %c0_54 = arith.constant 0 : index
    %82 = vector.load %arg18[%c0_53, %c0_54] : memref<64x64xbf16, #tpu.memory_space<vmem>>, vector<64x64xbf16>
    %cst_55 = arith.constant dense<0.000000e+00> : vector<8x64xf32>
    %83 = tpu.matmul %81, %82, %cst_55 {dimension_numbers = #tpu.dot_dimension_numbers<[1], [0], [0], [1], [0, 0, 1, 1], [], []>} : vector<8x64xbf16>, vector<64x64xbf16>, vector<8x64xf32> -> vector<8x64xf32>
    %84 = arith.addf %80, %83 : vector<8x64xf32>
    %c0_56 = arith.constant 0 : index
    %c0_57 = arith.constant 0 : index
    %85 = vector.load %arg19[%c0_56, %c0_57] : memref<1x64xf32, #tpu.memory_space<vmem>>, vector<1x64xf32>
    %86 = vector.broadcast %85 : vector<1x64xf32> to vector<8x64xf32>
    %87 = arith.addf %84, %86 : vector<8x64xf32>
    %cst_58 = arith.constant 0.000000e+00 : f32
    %88 = vector.broadcast %cst_58 : f32 to vector<8x64xf32>
    %89 = arith.cmpf oge, %87, %88 : vector<8x64xf32>
    %cst_59 = arith.constant 4.000000e-01 : f32
    %90 = vector.broadcast %cst_59 : f32 to vector<8x64xf32>
    %91 = arith.mulf %90, %87 : vector<8x64xf32>
    %92 = arith.select %89, %87, %91 : vector<8x64xi1>, vector<8x64xf32>
    %93 = arith.truncf %92 : vector<8x64xf32> to vector<8x64xbf16>
    %c0_60 = arith.constant 0 : index
    %c0_61 = arith.constant 0 : index
    %94 = vector.load %arg20[%c0_60, %c0_61] : memref<64x64xbf16, #tpu.memory_space<vmem>>, vector<64x64xbf16>
    %cst_62 = arith.constant dense<0.000000e+00> : vector<8x64xf32>
    %95 = tpu.matmul %93, %94, %cst_62 {dimension_numbers = #tpu.dot_dimension_numbers<[1], [0], [0], [1], [0, 0, 1, 1], [], []>} : vector<8x64xbf16>, vector<64x64xbf16>, vector<8x64xf32> -> vector<8x64xf32>
    %c0_63 = arith.constant 0 : index
    %c0_64 = arith.constant 0 : index
    %96 = vector.load %arg21[%c0_63, %c0_64] : memref<1x64xf32, #tpu.memory_space<vmem>>, vector<1x64xf32>
    %97 = vector.broadcast %96 : vector<1x64xf32> to vector<8x64xf32>
    %98 = arith.addf %95, %97 : vector<8x64xf32>
    %cst_65 = arith.constant 0.000000e+00 : f32
    %99 = vector.broadcast %cst_65 : f32 to vector<8x64xf32>
    %100 = arith.cmpf oge, %98, %99 : vector<8x64xf32>
    %cst_66 = arith.constant 4.000000e-01 : f32
    %101 = vector.broadcast %cst_66 : f32 to vector<8x64xf32>
    %102 = arith.mulf %101, %98 : vector<8x64xf32>
    %103 = arith.select %100, %98, %102 : vector<8x64xi1>, vector<8x64xf32>
    %104 = arith.truncf %103 : vector<8x64xf32> to vector<8x64xbf16>
    %c0_67 = arith.constant 0 : index
    %c0_68 = arith.constant 0 : index
    %105 = vector.load %arg22[%c0_67, %c0_68] : memref<64x8xbf16, #tpu.memory_space<vmem>>, vector<64x8xbf16>
    %cst_69 = arith.constant dense<0.000000e+00> : vector<8x8xf32>
    %106 = tpu.matmul %104, %105, %cst_69 {dimension_numbers = #tpu.dot_dimension_numbers<[1], [0], [0], [1], [0, 0, 1, 1], [], []>} : vector<8x64xbf16>, vector<64x8xbf16>, vector<8x8xf32> -> vector<8x8xf32>
    %c0_70 = arith.constant 0 : index
    %c0_71 = arith.constant 0 : index
    %107 = vector.load %arg23[%c0_70, %c0_71] : memref<8x8xf32, #tpu.memory_space<vmem>>, vector<8x8xf32>
    tpu.vector_store %arg23[%c0_70, %c0_71], %106 {strides = array<i32>} : memref<8x8xf32, #tpu.memory_space<vmem>>, vector<8x8xf32>,
    return
  }
  func.func @transform_0(%arg0: i32) -> (i32, i32) {
    %c0_i32 = arith.constant 0 : i32
    %c0_i32_0 = arith.constant 0 : i32
    return %arg0, %c0_i32 : i32, i32
  }
  func.func @transform_1(%arg0: i32) -> (i32, i32) {
    %c0_i32 = arith.constant 0 : i32
    %c0_i32_0 = arith.constant 0 : i32
    return %arg0, %c0_i32 : i32, i32
  }
  func.func @transform_2(%arg0: i32) -> (i32, i32) {
    %c0_i32 = arith.constant 0 : i32
    %c0_i32_0 = arith.constant 0 : i32
    %c0_i32_1 = arith.constant 0 : i32
    return %c0_i32, %c0_i32_0 : i32, i32
  }
  func.func @transform_3(%arg0: i32) -> (i32, i32) {
    %c0_i32 = arith.constant 0 : i32
    %c0_i32_0 = arith.constant 0 : i32
    %c0_i32_1 = arith.constant 0 : i32
    return %c0_i32, %c0_i32_0 : i32, i32
  }
  func.func @transform_4(%arg0: i32) -> (i32, i32) {
    %c0_i32 = arith.constant 0 : i32
    %c0_i32_0 = arith.constant 0 : i32
    %c0_i32_1 = arith.constant 0 : i32
    return %c0_i32, %c0_i32_0 : i32, i32
  }
  func.func @transform_5(%arg0: i32) -> (i32, i32) {
    %c0_i32 = arith.constant 0 : i32
    %c0_i32_0 = arith.constant 0 : i32
    %c0_i32_1 = arith.constant 0 : i32
    return %c0_i32, %c0_i32_0 : i32, i32
  }
  func.func @transform_6(%arg0: i32) -> (i32, i32) {
    %c0_i32 = arith.constant 0 : i32
    %c0_i32_0 = arith.constant 0 : i32
    %c0_i32_1 = arith.constant 0 : i32
    return %c0_i32, %c0_i32_0 : i32, i32
  }
  func.func @transform_7(%arg0: i32) -> (i32, i32) {
    %c0_i32 = arith.constant 0 : i32
    %c0_i32_0 = arith.constant 0 : i32
    %c0_i32_1 = arith.constant 0 : i32
    return %c0_i32, %c0_i32_0 : i32, i32
  }
  func.func @transform_8(%arg0: i32) -> (i32, i32) {
    %c0_i32 = arith.constant 0 : i32
    %c0_i32_0 = arith.constant 0 : i32
    %c0_i32_1 = arith.constant 0 : i32
    return %c0_i32, %c0_i32_0 : i32, i32
  }
  func.func @transform_9(%arg0: i32) -> (i32, i32) {
    %c0_i32 = arith.constant 0 : i32
    %c0_i32_0 = arith.constant 0 : i32
    %c0_i32_1 = arith.constant 0 : i32
    return %c0_i32, %c0_i32_0 : i32, i32
  }
  func.func @transform_10(%arg0: i32) -> (i32, i32) {
    %c0_i32 = arith.constant 0 : i32
    %c0_i32_0 = arith.constant 0 : i32
    %c0_i32_1 = arith.constant 0 : i32
    return %c0_i32, %c0_i32_0 : i32, i32
  }
  func.func @transform_11(%arg0: i32) -> (i32, i32) {
    %c0_i32 = arith.constant 0 : i32
    %c0_i32_0 = arith.constant 0 : i32
    %c0_i32_1 = arith.constant 0 : i32
    return %c0_i32, %c0_i32_0 : i32, i32
  }
  func.func @transform_12(%arg0: i32) -> (i32, i32) {
    %c0_i32 = arith.constant 0 : i32
    %c0_i32_0 = arith.constant 0 : i32
    %c0_i32_1 = arith.constant 0 : i32
    return %c0_i32, %c0_i32_0 : i32, i32
  }
  func.func @transform_13(%arg0: i32) -> (i32, i32) {
    %c0_i32 = arith.constant 0 : i32
    %c0_i32_0 = arith.constant 0 : i32
    %c0_i32_1 = arith.constant 0 : i32
    return %c0_i32, %c0_i32_0 : i32, i32
  }
  func.func @transform_14(%arg0: i32) -> (i32, i32) {
    %c0_i32 = arith.constant 0 : i32
    %c0_i32_0 = arith.constant 0 : i32
    %c0_i32_1 = arith.constant 0 : i32
    return %c0_i32, %c0_i32_0 : i32, i32
  }
  func.func @transform_15(%arg0: i32) -> (i32, i32) {
    %c0_i32 = arith.constant 0 : i32
    %c0_i32_0 = arith.constant 0 : i32
    %c0_i32_1 = arith.constant 0 : i32
    return %c0_i32, %c0_i32_0 : i32, i32
  }
  func.func @transform_16(%arg0: i32) -> (i32, i32) {
    %c0_i32 = arith.constant 0 : i32
    %c0_i32_0 = arith.constant 0 : i32
    %c0_i32_1 = arith.constant 0 : i32
    return %c0_i32, %c0_i32_0 : i32, i32
  }
  func.func @transform_17(%arg0: i32) -> (i32, i32) {
    %c0_i32 = arith.constant 0 : i32
    %c0_i32_0 = arith.constant 0 : i32
    %c0_i32_1 = arith.constant 0 : i32
    return %c0_i32, %c0_i32_0 : i32, i32
  }
  func.func @transform_18(%arg0: i32) -> (i32, i32) {
    %c0_i32 = arith.constant 0 : i32
    %c0_i32_0 = arith.constant 0 : i32
    %c0_i32_1 = arith.constant 0 : i32
    return %c0_i32, %c0_i32_0 : i32, i32
  }
  func.func @transform_19(%arg0: i32) -> (i32, i32) {
    %c0_i32 = arith.constant 0 : i32
    %c0_i32_0 = arith.constant 0 : i32
    %c0_i32_1 = arith.constant 0 : i32
    return %c0_i32, %c0_i32_0 : i32, i32
  }
  func.func @transform_20(%arg0: i32) -> (i32, i32) {
    %c0_i32 = arith.constant 0 : i32
    %c0_i32_0 = arith.constant 0 : i32
    %c0_i32_1 = arith.constant 0 : i32
    return %c0_i32, %c0_i32_0 : i32, i32
  }
  func.func @transform_21(%arg0: i32) -> (i32, i32) {
    %c0_i32 = arith.constant 0 : i32
    %c0_i32_0 = arith.constant 0 : i32
    %c0_i32_1 = arith.constant 0 : i32
    return %c0_i32, %c0_i32_0 : i32, i32
  }
  func.func @transform_22(%arg0: i32) -> (i32, i32) {
    %c0_i32 = arith.constant 0 : i32
    %c0_i32_0 = arith.constant 0 : i32
    return %arg0, %c0_i32 : i32, i32
  }
}

</mosaic_0001>

<bundles_post_ra>
// kernel: tpu_custom_call.1
= control target key start
LH: loop header
LB: loop body
LE: loop exit
PB: predicated region body
PF: predicated region fallthrough
CT: control target
= control target key end

     0   :  { %s2005_s0 = inlined_call_operand.hbm [shape: f32[8,8], index: 0, kind: input, shape index: {}]   ;;  %s2006_s1 = inlined_call_operand.hbm [shape: f32[8,64], index: 1, kind: input, shape index: {}]   ;;  %s2007_s2 = inlined_call_operand.vmem [shape: bf16[64,32], index: 2, kind: input, shape index: {}]   ;;  %s2008_s3 = inlined_call_operand.hbm [shape: f32[1,32], index: 3, kind: input, shape index: {}]   ;;  %s2009_s4 = inlined_call_operand.hbm [shape: bf16[32,32], index: 4, kind: input, shape index: {}]   ;;  %s2010_s5 = inlined_call_operand.hbm [shape: f32[1,32], index: 5, kind: input, shape index: {}]   ;;  %s2011_s6 = inlined_call_operand.hbm [shape: bf16[32,32], index: 6, kind: input, shape index: {}]   ;;  %s2012_s7 = inlined_call_operand.hbm [shape: f32[1,32], index: 7, kind: input, shape index: {}]   ;;  %s2013_s8 = inlined_call_operand.hbm [shape: bf16[32,32], index: 8, kind: input, shape index: {}]   ;;  %s2014_s9 = inlined_call_operand.hbm [shape: f32[1,32], index: 9, kind: input, shape index: {}]   ;;  %s2015_s10 = inlined_call_operand.hbm [shape: bf16[32,64], index: 10, kind: input, shape index: {}]   ;;  %s2016_s11 = inlined_call_operand.vmem [shape: bf16[8,32], index: 11, kind: input, shape index: {}]   ;;  %s2017_s12 = inlined_call_operand.vmem [shape: f32[1,32], index: 12, kind: input, shape index: {}]   ;;  %s2018_s13 = inlined_call_operand.hbm [shape: bf16[32,32], index: 13, kind: input, shape index: {}]   ;;  %s2019_s14 = inlined_call_operand.vmem [shape: f32[1,32], index: 14, kind: input, shape index: {}]   ;;  %s2020_s15 = inlined_call_operand.hbm [shape: bf16[32,64], index: 15, kind: input, shape index: {}]   ;;  %s2021_s16 = inlined_call_operand.vmem [shape: bf16[64,64], index: 16, kind: input, shape index: {}]   ;;  %s2022_s17 = inlined_call_operand.vmem [shape: bf16[64,64], index: 17, kind: input, shape index: {}]   ;;  %s2023_s18 = inlined_call_operand.vmem [shape: f32[1,64], index: 18, kind: input, shape index: {}]   ;;  %s2024_s19 = inlined_call_operand.vmem [shape: bf16[64,64], index: 19, kind: input, shape index: {}]   ;;  %s2025_s20 = inlined_call_operand.vmem [shape: f32[1,64], index: 20, kind: input, shape index: {}]   ;;  %s2026_s21 = inlined_call_operand.vmem [shape: bf16[64,8], index: 21, kind: input, shape index: {}]   ;;  %s2027_s22 = inlined_call_operand.hbm [shape: f32[8,8], index: 22, kind: output, shape index: {}]  }
   0x1   :  { %2029 = sst [smem:[#allocation31_spill]] %s2005_s0 }
   0x2   :  { %2030 = sst [smem:[#allocation32_spill]] %s2006_s1 }
   0x3   :  { %2031 = sst [smem:[#allocation33_spill]] %s2007_s2 }
   0x4   :  { %2032 = sst [smem:[#allocation34_spill]] %s2008_s3 }
   0x5   :  { %2033 = sst [smem:[#allocation35_spill]] %s2009_s4 }
   0x6   :  { %2034 = sst [smem:[#allocation36_spill]] %s2010_s5 }
   0x7   :  { %2035 = sst [smem:[#allocation37_spill]] %s2011_s6 }
   0x8   :  { %27 = vsyncpa [#allocation3], 0 }
   0x9   :  { %28 = vsyncpa [#allocation6], 0 }
   0xa   :  { %29 = vsyncpa [#allocation9], 0 }
   0xb   :  { %30 = vsyncpa [#allocation12], 0 }
   0xc   :  { %31 = vsyncpa [#allocation15], 0 }
   0xd   :  { %32 = vsyncpa [#allocation18], 0 }
   0xe   :  { %33 = vsyncpa [#allocation21], 0 }
   0xf   :  { %34 = vsyncpa [#allocation4], 0  ;;  %s1671_s3 = smov [#allocation5]   ;;  %s1672_s29 = smov [#allocation8]  }
  0x10   :  { %s51_s28 = sshll.u32 %s1671_s3, 4  ;;  %s72_s30 = sshll.u32 %s1672_s29, 4  ;;  %s52_s28 = int_to_ptr.vmem [resolvable:$true] %s51_s28  ;;  %s73_s30 = int_to_ptr.vmem [resolvable:$true] %s72_s30 }
  0x11   :  { %s1403_s4 = scalar_lea.vmem %s52_s28, 128  ;;  %p1408_p1 = scmp.lt.s32.totalorder %s52_s28, %s52_s28 }
  0x12   :  { %p1404_p0 = scmp.ne.s32.totalorder %s52_s28, %s1403_s4  ;;  %p1409_p2 = scmp.lt.s32.totalorder %s1403_s4, %s1403_s4 }
  0x14   :  { %p1410_p3 = por %p1409_p2, %p1408_p1 }
  0x16   :  { %p1411_p4 = pnand %p1410_p3, %p1404_p0 }
  0x18   :  { %1414 = shalt.err (!%p1411_p4)
}
  0x19   :  { %s2036_s1 = sld [smem:[#allocation32_spill]]  ;;  %s1423_s5 = scalar_lea.vmem %s73_s30, 256 }
  0x1a   :  { %p1424_p5 = scmp.ne.s32.totalorder %s73_s30, %s1423_s5  ;;  %p1428_p6 = scmp.lt.s32.totalorder %s73_s30, %s73_s30 }
  0x1b   :  { %p1429_p7 = scmp.lt.s32.totalorder %s1423_s5, %s1423_s5 }
  0x1d   :  { %p1430_p8 = por %p1429_p7, %p1428_p6 }
  0x1f   :  { %54 = dma.hbm_to_vmem [thread:$0]  %s2036_s1, 128, %s52_s28, [#allocation6]  }
  0x20   :  { %p1431_p9 = pnand %p1430_p8, %p1424_p5 }
  0x22   :  { %1434 = shalt.err (!%p1431_p9)
}
  0x23   :  { %s1673_s24 = smov 64   ;;  %s1674_s6 = smov 4  }
  0x24   :  { %s2037_s2 = sld [smem:[#allocation35_spill]]  ;;  %s1675_s27 = smov [#allocation11]  }
  0x25   :  { %s94_s3 = sshll.u32 %s1675_s27, 4  ;;  %s1676_s29 = smov [#allocation14]   ;;  %s95_s3 = int_to_ptr.vmem [resolvable:$true] %s94_s3 }
  0x26   :  { %s116_s28 = sshll.u32 %s1676_s29, 4  ;;  %s1443_s4 = scalar_lea.vmem %s95_s3, 256  ;;  %s117_s28 = int_to_ptr.vmem [resolvable:$true] %s116_s28 }
  0x27   :  { %p1444_p10 = scmp.ne.s32.totalorder %s95_s3, %s1443_s4  ;;  %p1448_p11 = scmp.lt.s32.totalorder %s95_s3, %s95_s3 }
  0x28   :  { %p1449_p12 = scmp.lt.s32.totalorder %s1443_s4, %s1443_s4 }
  0x2a   :  { %78 = dma.hbm_to_vmem [thread:$0]  %s2037_s2, 256, %s73_s30, [#allocation9], %s1673_s24, %s1673_s24, %s1674_s6  }
  0x2b   :  { %p1450_p13 = por %p1449_p12, %p1448_p11 }
  0x2d   :  { %p1451_p0 = pnand %p1450_p13, %p1444_p10 }
  0x2f   :  { %1454 = shalt.err (!%p1451_p0)
}
  0x30   :  { %s2038_s1 = sld [smem:[#allocation37_spill]]  ;;  %s1463_s30 = scalar_lea.vmem %s117_s28, 256 }
  0x31   :  { %p1464_p1 = scmp.ne.s32.totalorder %s117_s28, %s1463_s30  ;;  %p1468_p2 = scmp.lt.s32.totalorder %s117_s28, %s117_s28 }
  0x32   :  { %p1469_p3 = scmp.lt.s32.totalorder %s1463_s30, %s1463_s30 }
  0x34   :  { %p1470_p4 = por %p1469_p3, %p1468_p2 }
  0x36   :  { %100 = dma.hbm_to_vmem [thread:$0]  %s2038_s1, 256, %s95_s3, [#allocation12], %s1673_s24, %s1673_s24, %s1674_s6  }
  0x37   :  { %p1471_p5 = pnand %p1470_p4, %p1464_p1 }
  0x39   :  { %1474 = shalt.err (!%p1471_p5)
}
  0x3a   :  { %122 = dma.hbm_to_vmem [thread:$0]  %s2013_s8, 256, %s117_s28, [#allocation15], %s1673_s24, %s1673_s24, %s1674_s6  }
  0x3b   :  { %s1677_s26 = smov [#allocation17]   ;;  %s1678_s27 = smov [#allocation2]  }
  0x3c   :  { %s138_s2 = sshll.u32 %s1677_s26, 4  ;;  %s41_s29 = sshll.u32 %s1678_s27, 4  ;;  %s139_s2 = int_to_ptr.vmem [resolvable:$true] %s138_s2  ;;  %s42_s29 = int_to_ptr.vmem [resolvable:$true] %s41_s29 }
  0x3d   :  { %s1483_s3 = scalar_lea.vmem %s139_s2, 256  ;;  %p1488_p7 = scmp.lt.s32.totalorder %s139_s2, %s139_s2 }
  0x3e   :  { %p1484_p6 = scmp.ne.s32.totalorder %s139_s2, %s1483_s3  ;;  %p1489_p8 = scmp.lt.s32.totalorder %s1483_s3, %s1483_s3 }
  0x40   :  { %p1490_p9 = por %p1489_p8, %p1488_p7 }
  0x42   :  { %p1491_p10 = pnand %p1490_p9, %p1484_p6 }
  0x44   :  { %1494 = shalt.err (!%p1491_p10)
}
  0x45   :  { %144 = dma.hbm_to_vmem [thread:$0]  %s2015_s10, 256, %s139_s2, [#allocation18], %s1673_s24, %s1673_s24, %s1674_s6  }
  0x46   :  { %s1503_s8 = scalar_lea.vmem %s42_s29, 128  ;;  %p1508_p12 = scmp.lt.s32.totalorder %s42_s29, %s42_s29 }
  0x47   :  { %p1504_p11 = scmp.ne.s32.totalorder %s42_s29, %s1503_s8  ;;  %p1509_p13 = scmp.lt.s32.totalorder %s1503_s8, %s1503_s8 }
  0x49   :  { %p1510_p0 = por %p1509_p13, %p1508_p12 }
  0x4b   :  { %p1511_p1 = pnand %p1510_p0, %p1504_p11 }
  0x4d   :  { %1514 = shalt.err (!%p1511_p1)
}
  0x4e   :  { %s2039_s1 = sld [smem:[#allocation31_spill]]  ;;  %s1679_s30 = smov [#allocation7]  }
  0x4f   :  { %s63_s5 = sshll.u32 %s1679_s30, 4  ;;  %s1680_s25 = smov [#allocation10]   ;;  %s64_s5 = int_to_ptr.vmem [resolvable:$true] %s63_s5 }
  0x50   :  { %s85_s26 = sshll.u32 %s1680_s25, 4  ;;  %s1523_s27 = scalar_lea.vmem %s64_s5, 16  ;;  %s86_s26 = int_to_ptr.vmem [resolvable:$true] %s85_s26 }
  0x51   :  { %p1524_p2 = scmp.ne.s32.totalorder %s64_s5, %s1523_s27  ;;  %s1527_s10 = scalar_lea.vmem %s64_s5, 32 }
  0x52   :  { %p1528_p3 = scmp.lt.s32.totalorder %s64_s5, %s64_s5  ;;  %p1529_p4 = scmp.lt.s32.totalorder %s1527_s10, %s1523_s27 }
  0x54   :  { %44 = dma.hbm_to_vmem [thread:$0]  %s2039_s1, 128, %s42_s29, [#allocation3]  }
  0x55   :  { %p1530_p5 = por %p1529_p4, %p1528_p3 }
  0x57   :  { %p1531_p6 = pnand %p1530_p5, %p1524_p2 }
  0x59   :  { %1534 = shalt.err (!%p1531_p6)
}
  0x5a   :  { %s2040_s4 = sld [smem:[#allocation34_spill]]  ;;  %s1543_s0 = scalar_lea.vmem %s86_s26, 16 }
  0x5b   :  { %p1544_p7 = scmp.ne.s32.totalorder %s86_s26, %s1543_s0  ;;  %s1547_s29 = scalar_lea.vmem %s86_s26, 32 }
  0x5c   :  { %p1548_p8 = scmp.lt.s32.totalorder %s86_s26, %s86_s26  ;;  %p1549_p9 = scmp.lt.s32.totalorder %s1547_s29, %s1543_s0 }
  0x5e   :  { %p1550_p10 = por %p1549_p9, %p1548_p8 }
  0x60   :  { %66 = dma.hbm_to_vmem [thread:$0]  %s2040_s4, 16, %s64_s5, [#allocation6]  }
  0x61   :  { %p1551_p11 = pnand %p1550_p10, %p1544_p7 }
  0x63   :  { %1554 = shalt.err (!%p1551_p11)
}
  0x64   :  { %s2041_s23 = sld [smem:[#allocation36_spill]]  ;;  %s1681_s1 = smov [#allocation13]  }
  0x65   :  { %s107_s30 = sshll.u32 %s1681_s1, 4  ;;  %s1682_s25 = smov [#allocation16]   ;;  %s108_s30 = int_to_ptr.vmem [resolvable:$true] %s107_s30 }
  0x66   :  { %s129_s27 = sshll.u32 %s1682_s25, 4  ;;  %s1563_s10 = scalar_lea.vmem %s108_s30, 16  ;;  %s130_s27 = int_to_ptr.vmem [resolvable:$true] %s129_s27 }
  0x67   :  { %p1564_p12 = scmp.ne.s32.totalorder %s108_s30, %s1563_s10  ;;  %s1567_s5 = scalar_lea.vmem %s108_s30, 32 }
  0x68   :  { %p1568_p13 = scmp.lt.s32.totalorder %s108_s30, %s108_s30  ;;  %p1569_p0 = scmp.lt.s32.totalorder %s1567_s5, %s1563_s10 }
  0x6a   :  { %88 = dma.hbm_to_vmem [thread:$0]  %s2041_s23, 16, %s86_s26, [#allocation9]  }
  0x6b   :  { %p1570_p1 = por %p1569_p0, %p1568_p13 }
  0x6d   :  { %p1571_p2 = pnand %p1570_p1, %p1564_p12 }
  0x6f   :  { %1574 = shalt.err (!%p1571_p2)
}
  0x70   :  { %110 = dma.hbm_to_vmem [thread:$0]  %s2012_s7, 16, %s108_s30, [#allocation12]  }
  0x71   :  { %s1583_s4 = scalar_lea.vmem %s130_s27, 16  ;;  %s1587_s26 = scalar_lea.vmem %s130_s27, 32 }
  0x72   :  { %p1584_p3 = scmp.ne.s32.totalorder %s130_s27, %s1583_s4  ;;  %p1588_p4 = scmp.lt.s32.totalorder %s130_s27, %s130_s27 }
  0x73   :  { %p1589_p5 = scmp.lt.s32.totalorder %s1587_s26, %s1583_s4 }
  0x75   :  { %p1590_p6 = por %p1589_p5, %p1588_p4 }
  0x77   :  { %p1591_p7 = pnand %p1590_p6, %p1584_p3 }
  0x79   :  { %1594 = shalt.err (!%p1591_p7)
}
  0x7a   :  { %132 = dma.hbm_to_vmem [thread:$0]  %s2014_s9, 16, %s130_s27, [#allocation15]  }
  0x7b   :  { %s1683_s8 = smov [#allocation19]   ;;  %s1684_s23 = smov [#allocation20]  }
  0x7c   :  { %s154_s28 = sshll.u32 %s1683_s8, 4  ;;  %s168_s1 = sshll.u32 %s1684_s23, 4  ;;  %s155_s28 = int_to_ptr.vmem [resolvable:$true] %s154_s28  ;;  %s169_s1 = int_to_ptr.vmem [resolvable:$true] %s168_s1 }
  0x7d   :  { %s1603_s25 = scalar_lea.vmem %s155_s28, 256  ;;  %p1608_p9 = scmp.lt.s32.totalorder %s155_s28, %s155_s28 }
  0x7e   :  { %p1604_p8 = scmp.ne.s32.totalorder %s155_s28, %s1603_s25  ;;  %p1609_p10 = scmp.lt.s32.totalorder %s1603_s25, %s1603_s25 }
  0x80   :  { %p1610_p11 = por %p1609_p10, %p1608_p9 }
  0x82   :  { %p1611_p12 = pnand %p1610_p11, %p1604_p8 }
  0x84   :  { %1614 = shalt.err (!%p1611_p12)
}
  0x85   :  { %160 = dma.hbm_to_vmem [thread:$0]  %s2018_s13, 256, %s155_s28, [#allocation18], %s1673_s24, %s1673_s24, %s1674_s6  }
  0x86   :  { %s1623_s9 = scalar_lea.vmem %s169_s1, 256  ;;  %p1628_p0 = scmp.lt.s32.totalorder %s169_s1, %s169_s1 }
  0x87   :  { %p1624_p13 = scmp.ne.s32.totalorder %s169_s1, %s1623_s9  ;;  %p1629_p1 = scmp.lt.s32.totalorder %s1623_s9, %s1623_s9 }
  0x89   :  { %p1630_p2 = por %p1629_p1, %p1628_p0 }
  0x8b   :  { %p1631_p3 = pnand %p1630_p2, %p1624_p13 }
  0x8d   :  { %1634 = shalt.err (!%p1631_p3)
}
  0x8e   :  { %174 = dma.hbm_to_vmem [thread:$0]  %s2020_s15, 256, %s169_s1, [#allocation21], %s1673_s24, %s1673_s24, %s1674_s6  }
  0x8f   :  { %1655 = dma.done.wait [#allocation3], 128  }
  0x90   :  { %1656 = vsyncadd [#allocation3], 4294967168 }
  0x91   :  { %1657 = dma.done.wait [#allocation6], 144  }
  0x92   :  { %1658 = vsyncadd [#allocation6], 4294967152 }
  0x93   :  { %1659 = dma.done.wait [#allocation9], 272  }
  0x94   :  { %1660 = vsyncadd [#allocation9], 4294967024 }
  0x95   :  { %1661 = dma.done.wait [#allocation12], 272  }
  0x96   :  { %1662 = vsyncadd [#allocation12], 4294967024 }
  0x97   :  { %1663 = dma.done.wait [#allocation15], 272  }
  0x98   :  { %1664 = vsyncadd [#allocation15], 4294967024 }
  0x99   :  { %1665 = dma.done.wait [#allocation18], 512  }
  0x9a   :  { %1666 = vsyncadd [#allocation18], 4294966784 }
  0x9b   :  { %1667 = dma.done.wait [#allocation21], 256  }
  0x9c   :  { %1668 = vsyncadd [#allocation21], 4294967040  ;;  %v1685_v0 = vmov 0.0   ;;  %vm1686_vm0 = vmmov 0   ;;  %s2042_s24 = sld [smem:[#allocation33_spill]]  ;;  %vm265_vm1 = vcmask 523264  }
  0x9d   :  { %1224 = vmatprep.subr.bf16.mxu0 %v1685_v0  ;;  %1232 = vmatprep.mubr.msk.bf16.mxu0 %vm1686_vm0, %v1685_v0  ;;  %v224_v5 = vld [vmem:[#allocation5] sm:$0xff]  ;;  %v1359_v7 = vld [vmem:[#allocation8 + $0x8] sm:$0xff]   ;;  %v1360_v8 = vld [vmem:[#allocation8] sm:$0xff]   ;;  %vm339_vm2 = vcmask 261120   ;;  %vm603_vm4 = vcmask 1043456   ;;  %vm599_vm5 = vcmask 64512  }
  0x9e   :  { %1236 = vmatprep.subr.bf16.mxu1 %v1685_v0  ;;  %1240 = vmatprep.mubr.msk.bf16.mxu1 %vm1686_vm0, %v1685_v0  ;;  %v225_v6 = vpack.c.bf16 %v224_v5, %v224_v5  ;;  %v1127_v9 = vld [vmem:[#allocation7] ss:$0 sm:$0xff]  ;;  %v1362_v23 = vld [vmem:[#allocation11] sm:$0xff]   ;;  %v1133_v24 = vld [vmem:[#allocation10] ss:$0 sm:$0xff]  ;;  %s1687_s10 = smov [#allocation22]  }
  0x9f   :  { %1237 = vmatpush3.bf16.msra.mxu1 %v1359_v7  ;;  %v1361_v22 = vld [vmem:[#allocation11 + $0x8] sm:$0xff]   ;;  %v1363_v37 = vld [vmem:[#allocation14 + $0x8] sm:$0xff]   ;;  %v1364_v38 = vld [vmem:[#allocation14] sm:$0xff]   ;;  %s1112_s13 = sshll.u32 %s1687_s10, 4  ;;  %s1113_s13 = int_to_ptr.vmem [resolvable:$true] %s1112_s13 }
  0xa0   :  { %1238 = vmatprep.subr.bf16.mxu1 %v1685_v0  ;;  %v1137_v39 = vld [vmem:[#allocation13] ss:$0 sm:$0xff]  ;;  %v591_v44 = vld [vmem:[%s2016_s11] sm:$0xf]  ;;  %v1366_v53 = vld [vmem:[#allocation17] sm:$0xff]   ;;  %p1640_p5 = scmp.lt.s32.totalorder %s1113_s13, %s1113_s13 }
  0xa1   :  { %v605_v49 = vsel %vm603_vm4, %v591_v44, 0  ;;  %v589_v50 = vld [vmem:[#allocation2] sm:$0xff]  ;;  %v1365_v52 = vld [vmem:[#allocation17 + $0x8] sm:$0xff]  }
  0xa2   :  { %v1355_v1 = vld [vmem:[%s2042_s24 + $0x18] sm:$0xff]   ;;  %v1356_v2 = vld [vmem:[%s2042_s24 + $0x10] sm:$0xff]   ;;  %v1357_v3 = vld [vmem:[%s2042_s24 + $0x8] sm:$0xff]   ;;  %v590_v51 = vpack.c.bf16 %v589_v50, %v589_v50 }
  0xa3   :  { %1225 = vmatpush3.bf16.msra.mxu0 %v1355_v1  ;;  %v1358_v4 = vld [vmem:[%s2042_s24] sm:$0xff]   ;;  %1239 = vmatpush3.bf16.msra.mxu1 %v1360_v8 }
  0xa4   :  { %1226 = vmatprep.subr.bf16.mxu0 %v1685_v0  ;;  %1244 = vmatprep.subr.bf16.mxu1 %v1685_v0  ;;  %v1141_v54 = vld [vmem:[#allocation16] ss:$0 sm:$0xff]  ;;  %v1148_v1 = vld [vmem:[%s2017_s12] ss:$0 sm:$0xff] }
  0xa5   :  { %v1367_v61 = vld [vmem:[#allocation19 + $0x8] sm:$0xff]  }
  0xa7   :  { %1227 = vmatpush3.bf16.msra.mxu0 %v1356_v2 }
  0xa8   :  { %1228 = vmatprep.subr.bf16.mxu0 %v1685_v0 }
  0xab   :  { %1229 = vmatpush3.bf16.msra.mxu0 %v1357_v3 }
  0xac   :  { %1230 = vmatprep.subr.bf16.mxu0 %v1685_v0 }
  0xaf   :  { %1231 = vmatpush3.bf16.msra.mxu0 %v1358_v4  ;;  %v1368_v4 = vld [vmem:[#allocation19] sm:$0xff]  }
  0xb0   :  { %1252 = vmatprep.subr.bf16.mxu0 %v1685_v0 }
  0xb2   :  { %1233 = vmatmul.mubr.msk.bf16.vlgmr.msra.gmra.mxu0 %vm265_vm1, %v225_v6 }
  0xb3   :  { %1256 = vmatprep.mubr.msk.bf16.mxu0 %vm1686_vm0, %v1685_v0  ;;  %1253 = vmatpush3.bf16.msra.mxu0 %v1363_v37 }
  0xb4   :  { %1254 = vmatprep.subr.bf16.mxu0 %v1685_v0 }
  0xb7   :  { %1255 = vmatpush3.bf16.msra.mxu0 %v1364_v38 }
  0xb8   :  { %1268 = vmatprep.subr.bf16.mxu0 %v1685_v0 }
 0x172   :  { %v303_v10 = vpop.f32.mrf.mxu0 }
 0x173   :  { %v304_v11 = vadd.f32 %v1127_v9, %v303_v10  ;;  %v1369_v9 = vld [vmem:[%s2022_s17 + $0x18] sm:$0xff]  }
 0x174   :  { %v1234_v12 = vpop.f32.mrf.mxu0 }
 0x175   :  { %v309_v13 = vsub.f32 0.0, %v304_v11  ;;  %v1370_v12 = vld [vmem:[%s2022_s17 + $0x10] sm:$0xff]  }
 0x176   :  { %v306_v14 = vpop.f32.mrf.mxu0 }
 0x177   :  { %v310_v15 = vmul.f32 1.442695, %v309_v13  ;;  %v1371_v13 = vld [vmem:[%s2022_s17 + $0x8] sm:$0xff]   ;;  %v1372_v14 = vld [vmem:[%s2022_s17] sm:$0xff]  }
 0x178   :  { %v1235_v16 = vpop.f32.mrf.mxu0 }
 0x179   :  { %1387 = vpow2.f32 %v310_v15  ;;  %v1373_v15 = vld [vmem:[#allocation20 + $0x8] sm:$0xff]   ;;  %v1374_v16 = vld [vmem:[#allocation20] sm:$0xff]  }
 0x186   :  { %v1388_v17 = vpop.eup %1387 }
 0x187   :  { %v312_v18 = vadd.f32 1.0, %v1388_v17 }
 0x189   :  { %1389 = vrcp.f32 %v312_v18 }
 0x196   :  { %v1390_v19 = vpop.eup %1389 }
 0x197   :  { %v314_v20 = vmul.f32 %v1390_v19, %v304_v11 }
 0x199   :  { %v315_v21 = vpack.c.bf16 %v314_v20, %v314_v20 }
 0x19b   :  { %1241 = vmatmul.mubr.msk.bf16.vlgmr.msra.gmra.mxu1 %vm339_vm2, %v315_v21 }
 0x19c   :  { %1248 = vmatprep.mubr.msk.bf16.mxu1 %vm1686_vm0, %v1685_v0  ;;  %1245 = vmatpush3.bf16.msra.mxu1 %v1361_v22  ;;  %v1150_v22 = vld [vmem:[%s2019_s14] ss:$0 sm:$0xff] }
 0x19d   :  { %1246 = vmatprep.subr.bf16.mxu1 %v1685_v0 }
 0x1a0   :  { %1247 = vmatpush3.bf16.msra.mxu1 %v1362_v23 }
 0x1a1   :  { %1260 = vmatprep.subr.bf16.mxu1 %v1685_v0 }
 0x25b   :  { %v377_v25 = vpop.f32.mrf.mxu1 }
 0x25c   :  { %v378_v26 = vadd.f32 %v1133_v24, %v377_v25 }
 0x25d   :  { %v1242_v27 = vpop.f32.mrf.mxu1 }
 0x25e   :  { %v383_v28 = vsub.f32 0.0, %v378_v26 }
 0x25f   :  { %v380_v29 = vpop.f32.mrf.mxu1 }
 0x260   :  { %v384_v30 = vmul.f32 1.442695, %v383_v28 }
 0x261   :  { %v1243_v31 = vpop.f32.mrf.mxu1 }
 0x262   :  { %1391 = vpow2.f32 %v384_v30  ;;  %v1375_v31 = vld [vmem:[%s2021_s16 + $0x18] sm:$0xff]  }
 0x26f   :  { %v1392_v32 = vpop.eup %1391 }
 0x270   :  { %v386_v33 = vadd.f32 1.0, %v1392_v32  ;;  %v1376_v32 = vld [vmem:[%s2021_s16 + $0x10] sm:$0xff]  }
 0x272   :  { %1393 = vrcp.f32 %v386_v33  ;;  %v1377_v33 = vld [vmem:[%s2021_s16 + $0x8] sm:$0xff]  }
 0x27f   :  { %v1394_v34 = vpop.eup %1393 }
 0x280   :  { %v388_v35 = vmul.f32 %v1394_v34, %v378_v26  ;;  %v1378_v34 = vld [vmem:[%s2021_s16] sm:$0xff]  }
 0x282   :  { %v389_v36 = vpack.c.bf16 %v388_v35, %v388_v35  ;;  %v1379_v35 = vld [vmem:[%s2024_s19 + $0x18] sm:$0xff]  }
 0x284   :  { %1249 = vmatmul.mubr.msk.bf16.vlgmr.msra.gmra.mxu1 %vm339_vm2, %v389_v36  ;;  %v1380_v36 = vld [vmem:[%s2024_s19 + $0x10] sm:$0xff]  }
 0x285   :  { %1264 = vmatprep.mubr.msk.bf16.mxu1 %vm1686_vm0, %v1685_v0  ;;  %1261 = vmatpush3.bf16.msra.mxu1 %v1365_v52 }
 0x286   :  { %1262 = vmatprep.subr.bf16.mxu1 %v1685_v0 }
 0x289   :  { %1263 = vmatpush3.bf16.msra.mxu1 %v1366_v53 }
 0x28a   :  { %1274 = vmatprep.subr.bf16.mxu1 %v1685_v0 }
 0x344   :  { %v450_v40 = vpop.f32.mrf.mxu1 }
 0x345   :  { %v451_v41 = vadd.f32 %v1137_v39, %v450_v40 }
 0x346   :  { %v1250_v42 = vpop.f32.mrf.mxu1 }
 0x347   :  { %vm456_vm3 = vcmp.ge.f32.partialorder %v451_v41, 0.0  ;;  %v457_v43 = vmul.f32 0.4, %v451_v41 }
 0x348   :  { %v453_v45 = vpop.f32.mrf.mxu1 }
 0x349   :  { %v458_v46 = vsel %vm456_vm3, %v451_v41, %v457_v43 }
 0x34a   :  { %v459_v47 = vpack.c.bf16 %v458_v46, %v458_v46  ;;  %v1251_v48 = vpop.f32.mrf.mxu1  ;;  %v1381_v46 = vld [vmem:[%s2024_s19 + $0x8] sm:$0xff]  }
 0x34b   :  { %v1383_v48 = vld [vmem:[%s2026_s21 + $0x18] sm:$0xff]  }
 0x34c   :  { %1257 = vmatmul.mubr.msk.bf16.vlgmr.msra.gmra.mxu0 %vm339_vm2, %v459_v47  ;;  %v1382_v47 = vld [vmem:[%s2024_s19] sm:$0xff]  }
 0x34d   :  { %1269 = vmatpush3.bf16.msra.mxu0 %v605_v49  ;;  %1270 = vmatprep.mubr.msk.bf16.mxu0 %vm1686_vm0, %v1685_v0  ;;  %v1384_v49 = vld [vmem:[%s2026_s21 + $0x10] sm:$0xff]  }
 0x34e   :  { %1282 = vmatprep.subr.bf16.mxu0 %v1685_v0 }
 0x354   :  { %1271 = vmatmul.mubr.msk.bf16.vlgmr.msra.gmra.mxu0 %vm599_vm5, %v590_v51  ;;  %v1167_v51 = vld [vmem:[%s2023_s18] ss:$0 sm:$0xff] }
 0x355   :  { %1286 = vmatprep.mubr.msk.bf16.mxu0 %vm1686_vm0, %v1685_v0  ;;  %1283 = vmatpush3.bf16.msra.mxu0 %v1373_v15 }
 0x356   :  { %1284 = vmatprep.subr.bf16.mxu0 %v1685_v0 }
 0x359   :  { %1285 = vmatpush3.bf16.msra.mxu0 %v1374_v16 }
 0x35a   :  { %1302 = vmatprep.subr.bf16.mxu0 %v1685_v0 }
 0x40c   :  { %v520_v55 = vpop.f32.mrf.mxu0 }
 0x40d   :  { %v521_v56 = vadd.f32 %v1141_v54, %v520_v55 }
 0x40e   :  { %v1258_v57 = vpop.f32.mrf.mxu0 }
 0x40f   :  { %vm526_vm6 = vcmp.ge.f32.partialorder %v521_v56, 0.0  ;;  %v527_v58 = vmul.f32 0.4, %v521_v56 }
 0x410   :  { %v523_v59 = vpop.f32.mrf.mxu0 }
 0x411   :  { %v528_v60 = vsel %vm526_vm6, %v521_v56, %v527_v58 }
 0x412   :  { %v529_v62 = vpack.c.bf16 %v528_v60, %v528_v60  ;;  %v1259_v63 = vpop.f32.mrf.mxu0  ;;  %v1385_v60 = vld [vmem:[%s2026_s21 + $0x8] sm:$0xff]  }
 0x414   :  { %1265 = vmatmul.mubr.msk.bf16.vlgmr.msra.gmra.mxu1 %vm339_vm2, %v529_v62  ;;  %v641_v2 = vpop.f32.mrf.mxu0  ;;  %v1168_v62 = vld [vmem:[%s2025_s20] ss:$0 sm:$0xff] }
 0x415   :  { %v642_v3 = vadd.f32 %v1148_v1, %v641_v2  ;;  %1275 = vmatpush3.bf16.msra.mxu1 %v1367_v61  ;;  %1278 = vmatprep.mubr.msk.bf16.mxu1 %vm1686_vm0, %v1685_v0  ;;  %v1386_v61 = vld [vmem:[%s2026_s21] sm:$0xff]   ;;  %s1635_s21 = scalar_lea.vmem %s1113_s13, 128 }
 0x416   :  { %v1272_v5 = vpop.f32.mrf.mxu0  ;;  %1276 = vmatprep.subr.bf16.mxu1 %v1685_v0  ;;  %p1636_p4 = scmp.ne.s32.totalorder %s1113_s13, %s1635_s21  ;;  %p1641_p6 = scmp.lt.s32.totalorder %s1635_s21, %s1635_s21 }
 0x417   :  { %vm647_vm7 = vcmp.ge.f32.partialorder %v642_v3, 0.0  ;;  %v648_v6 = vmul.f32 0.4, %v642_v3 }
 0x418   :  { %v644_v7 = vpop.f32.mrf.mxu0  ;;  %p1642_p7 = por %p1641_p6, %p1640_p5 }
 0x419   :  { %v649_v8 = vsel %vm647_vm7, %v642_v3, %v648_v6  ;;  %1277 = vmatpush3.bf16.msra.mxu1 %v1368_v4 }
 0x41a   :  { %v650_v10 = vpack.c.bf16 %v649_v8, %v649_v8  ;;  %v1273_v11 = vpop.f32.mrf.mxu0  ;;  %1290 = vmatprep.subr.bf16.mxu1 %v1685_v0  ;;  %p1643_p8 = pnand %p1642_p7, %p1636_p4 }
 0x41c   :  { %1279 = vmatmul.mubr.msk.bf16.vlgmr.msra.gmra.mxu1 %vm339_vm2, %v650_v10 }
 0x41d   :  { %1291 = vmatpush3.bf16.msra.mxu1 %v1369_v9  ;;  %1298 = vmatprep.mubr.msk.bf16.mxu1 %vm1686_vm0, %v1685_v0 }
 0x41e   :  { %1292 = vmatprep.subr.bf16.mxu1 %v1685_v0 }
 0x421   :  { %1293 = vmatpush3.bf16.msra.mxu1 %v1370_v12 }
 0x422   :  { %1294 = vmatprep.subr.bf16.mxu1 %v1685_v0 }
 0x425   :  { %1295 = vmatpush3.bf16.msra.mxu1 %v1371_v13 }
 0x426   :  { %1296 = vmatprep.subr.bf16.mxu1 %v1685_v0 }
 0x429   :  { %1297 = vmatpush3.bf16.msra.mxu1 %v1372_v14 }
 0x42a   :  { %1314 = vmatprep.subr.bf16.mxu1 %v1685_v0 }
 0x4d4   :  { %v583_v17 = vpop.f32.mrf.mxu1 }
 0x4d5   :  { %v789_v18 = vpack.c.bf16 %v583_v17, %v583_v17 }
 0x4d6   :  { %v1266_v19 = vpop.f32.mrf.mxu1 }
 0x4d7   :  { %1299 = vmatmul.mubr.msk.bf16.vlgmr.msra.gmra.mxu1 %vm265_vm1, %v789_v18 }
 0x4d8   :  { %v586_v20 = vpop.f32.mrf.mxu1  ;;  %1322 = vmatprep.mubr.msk.bf16.mxu1 %vm1686_vm0, %v1685_v0  ;;  %1315 = vmatpush3.bf16.msra.mxu1 %v1379_v35 }
 0x4d9   :  { %1316 = vmatprep.subr.bf16.mxu1 %v1685_v0 }
 0x4da   :  { %v1267_v21 = vpop.f32.mrf.mxu1 }
 0x4dc   :  { %v711_v23 = vpop.f32.mrf.mxu1  ;;  %1317 = vmatpush3.bf16.msra.mxu1 %v1380_v36 }
 0x4dd   :  { %v712_v24 = vadd.f32 %v1150_v22, %v711_v23  ;;  %1318 = vmatprep.subr.bf16.mxu1 %v1685_v0 }
 0x4de   :  { %v1280_v25 = vpop.f32.mrf.mxu1 }
 0x4df   :  { %vm717_vm8 = vcmp.ge.f32.partialorder %v712_v24, 0.0  ;;  %v718_v26 = vmul.f32 0.4, %v712_v24 }
 0x4e0   :  { %v714_v27 = vpop.f32.mrf.mxu1  ;;  %1319 = vmatpush3.bf16.msra.mxu1 %v1381_v46 }
 0x4e1   :  { %v719_v28 = vsel %vm717_vm8, %v712_v24, %v718_v26  ;;  %1320 = vmatprep.subr.bf16.mxu1 %v1685_v0 }
 0x4e2   :  { %v720_v29 = vpack.c.bf16 %v719_v28, %v719_v28  ;;  %v1281_v30 = vpop.f32.mrf.mxu1 }
 0x4e4   :  { %1287 = vmatmul.mubr.msk.bf16.vlgmr.msra.gmra.mxu0 %vm339_vm2, %v720_v29  ;;  %1321 = vmatpush3.bf16.msra.mxu1 %v1382_v47 }
 0x4e5   :  { %1310 = vmatprep.mubr.msk.bf16.mxu0 %vm1686_vm0, %v1685_v0  ;;  %1303 = vmatpush3.bf16.msra.mxu0 %v1375_v31 }
 0x4e6   :  { %1304 = vmatprep.subr.bf16.mxu0 %v1685_v0 }
 0x4e9   :  { %1305 = vmatpush3.bf16.msra.mxu0 %v1376_v32 }
 0x4ea   :  { %1306 = vmatprep.subr.bf16.mxu0 %v1685_v0 }
 0x4ed   :  { %1307 = vmatpush3.bf16.msra.mxu0 %v1377_v33 }
 0x4ee   :  { %1308 = vmatprep.subr.bf16.mxu0 %v1685_v0 }
 0x4f1   :  { %1309 = vmatpush3.bf16.msra.mxu0 %v1378_v34 }
 0x4f2   :  { %1326 = vmatprep.subr.bf16.mxu0 %v1685_v0 }
 0x597   :  { %v859_v37 = vpop.f32.mrf.mxu1 }
 0x599   :  { %v1300_v38 = vpop.f32.mrf.mxu1 }
 0x59b   :  { %v862_v39 = vpop.f32.mrf.mxu1 }
 0x59d   :  { %v1301_v40 = vpop.f32.mrf.mxu1 }
 0x5a4   :  { %v774_v41 = vpop.f32.mrf.mxu0 }
 0x5a5   :  { %v780_v42 = vpack.c.bf16 %v774_v41, %v774_v41 }
 0x5a6   :  { %v1288_v43 = vpop.f32.mrf.mxu0 }
 0x5a7   :  { %1311 = vmatmul.mubr.msk.bf16.vlgmr.msra.gmra.mxu0 %vm265_vm1, %v780_v42 }
 0x5a8   :  { %v777_v44 = vpop.f32.mrf.mxu0  ;;  %1334 = vmatprep.mubr.msk.bf16.mxu0 %vm1686_vm0, %v1685_v0  ;;  %1327 = vmatpush3.bf16.msra.mxu0 %v1383_v48 }
 0x5a9   :  { %1328 = vmatprep.subr.bf16.mxu0 %v1685_v0 }
 0x5aa   :  { %v1289_v45 = vpop.f32.mrf.mxu0 }
 0x5ac   :  { %1329 = vmatpush3.bf16.msra.mxu0 %v1384_v49 }
 0x5ad   :  { %1330 = vmatprep.subr.bf16.mxu0 %v1685_v0 }
 0x5b0   :  { %1331 = vmatpush3.bf16.msra.mxu0 %v1385_v60 }
 0x5b1   :  { %1332 = vmatprep.subr.bf16.mxu0 %v1685_v0 }
 0x5b4   :  { %1333 = vmatpush3.bf16.msra.mxu0 %v1386_v61 }
 0x667   :  { %v926_v50 = vpop.f32.mrf.mxu0 }
 0x668   :  { %v927_v52 = vadd.f32 %v926_v50, %v859_v37 }
 0x669   :  { %v1312_v53 = vpop.f32.mrf.mxu0 }
 0x66a   :  { %v939_v54 = vadd.f32 %v1167_v51, %v927_v52 }
 0x66b   :  { %v929_v55 = vpop.f32.mrf.mxu0 }
 0x66c   :  { %vm940_vm9 = vcmp.ge.f32.partialorder %v939_v54, 0.0  ;;  %v941_v56 = vmul.f32 0.4, %v939_v54 }
 0x66d   :  { %v1313_v57 = vpop.f32.mrf.mxu0 }
 0x66e   :  { %v942_v58 = vsel %vm940_vm9, %v939_v54, %v941_v56 }
 0x66f   :  { %v943_v59 = vpack.c.bf16 %v942_v58, %v942_v58 }
 0x671   :  { %1323 = vmatmul.mubr.msk.bf16.vlgmr.msra.gmra.mxu1 %vm265_vm1, %v943_v59 }
 0x731   :  { %v1020_v63 = vpop.f32.mrf.mxu1 }
 0x732   :  { %v1021_v1 = vadd.f32 %v1168_v62, %v1020_v63 }
 0x733   :  { %v1324_v2 = vpop.f32.mrf.mxu1 }
 0x734   :  { %vm1026_vm10 = vcmp.ge.f32.partialorder %v1021_v1, 0.0  ;;  %v1027_v3 = vmul.f32 0.4, %v1021_v1 }
 0x735   :  { %v1023_v4 = vpop.f32.mrf.mxu1 }
 0x736   :  { %v1028_v5 = vsel %vm1026_vm10, %v1021_v1, %v1027_v3 }
 0x737   :  { %v1029_v6 = vpack.c.bf16 %v1028_v5, %v1028_v5  ;;  %v1325_v7 = vpop.f32.mrf.mxu1 }
 0x739   :  { %1335 = vmatmul.mubr.msk.bf16.vlgmr.msra.gmra.mxu0 %vm265_vm1, %v1029_v6 }
 0x7f9   :  { %v1099_v0 = vpop.f32.mrf.mxu0 }
 0x7fa   :  { %1105 = vst.msk [vmem:[#allocation22] sm:$0xff] %vm599_vm5, %v1099_v0 }
 0x7fb   :  { %v1336_v8 = vpop.f32.mrf.mxu0 }
 0x7fc   :  { %1646 = shalt.err (!%p1643_p8)
}
 0x7fd   :  { %1115 = dma.vmem_to_hbm [thread:$0]  %s1113_s13, 128, %s2027_s22, [#allocation4]   ;;  %v1102_v9 = vpop.f32.mrf.mxu0 }
 0x7ff   :  { %v1337_v10 = vpop.f32.mrf.mxu0 }
 0x800   :  { %1669 = dma.done.wait [#allocation4], 128  }
 0x801   :  { %1670 = vsyncadd [#allocation4], 4294967168 }
 0x802   :  { %1119 = vsyncpa [#allocation3], 1 }
 0x803   :  { %1120 = vsyncpa [#allocation6], 1 }
 0x804   :  { %1121 = vsyncpa [#allocation9], 1 }
 0x805   :  { %1122 = vsyncpa [#allocation12], 1 }
 0x806   :  { %1123 = vsyncpa [#allocation15], 1 }
 0x807   :  { %1124 = vsyncpa [#allocation18], 1 }
 0x808   :  { %1125 = vsyncpa [#allocation21], 1 }
 0x809   :  { %1126 = vsyncpa [#allocation4], 1 }

</bundles_post_ra>
